<compile_context>
chip_gen: v6e
topology: v6e:2x2x1
jax: 0.10.0
libtpu: 0.0.40
codegen_flags: <defaults>
</compile_context>

<pallas_src>
import math

import jax
import jax.numpy as jnp
from jax.experimental import pallas as pl
from jax.experimental.pallas import tpu as pltpu


def _make_pe_table(d_model: int, max_len: int = 4096) -> jnp.ndarray:
    """Sinusoidal positional-encoding buffer, shape (max_len, d_model), float32."""
    position = jnp.arange(max_len, dtype=jnp.float32)[:, None]          # (max_len, 1)
    div_term = jnp.exp(
        jnp.arange(0, d_model, 2, dtype=jnp.float32)
        * -(math.log(10000.0) / d_model)
    )                                                                    # (ceil(d/2),)
    angles = position * div_term                                         # (max_len, ceil(d/2))
    pe = jnp.zeros((max_len, d_model), dtype=jnp.float32)
    pe = pe.at[:, 0::2].set(jnp.sin(angles))
    # Slice handles odd d_model (cos gets d_model//2 columns); even d_model is a no-op.
    pe = pe.at[:, 1::2].set(jnp.cos(angles)[:, : d_model // 2])
    return pe


def _pe_add_kernel(x_ref, pe_ref, o_ref):
    # x_ref: (TILE_R, TILE_C); pe_ref: (1, TILE_C) broadcast over rows.
    x = x_ref[...]
    p = pe_ref[...]
    if p.dtype != x.dtype:
        # pe stays f32 in HBM (single rounding here for narrow x dtypes); the
        # add then runs natively in x's dtype (bf16 VALU on v6e/v7x; Mosaic
        # widens automatically on v5e). For f32 inputs this is a no-op.
        p = p.astype(x.dtype)
    o_ref[...] = (x + p).astype(o_ref.dtype)


def _choose_col_tile(c: int, min_rows: int, target_elems: int, lane: int = 128) -> int:
    """Largest lane-dense column tile whose (min_rows x tc) footprint fits the budget."""
    if c * min_rows <= target_elems:
        return c                                  # full row fits -> exempt from /128 rule
    # Caller guarantees c % lane == 0 on this path (padding if necessary).
    max_k = max(1, min(c // lane, target_elems // (lane * min_rows)))
    for k in range(max_k, 0, -1):
        if c % (lane * k) == 0:
            return lane * k
    return lane


def positional_encoding_forward(
    x: jnp.ndarray,
    pe: jnp.ndarray,
    *,
    target_tile_bytes: int = 4 * 1024 * 1024,     # 4 MiB x-tile: v7x sweet spot, fine on v5e/v6e
) -> jnp.ndarray:
    """x: (B, M, S, D); pe: (max_len, d_model) float32. Returns x + pe[:S] broadcast."""
    B, M, S, D = x.shape
    itemsize = x.dtype.itemsize
    lane = 128
    sublane = 8 * max(1, 4 // itemsize)           # 8 (f32) / 16 (bf16) / 32 (int8)

    R, C = B * M, S * D
    x2 = x.reshape(R, C)
    pe2 = pe[:S, :].reshape(1, C)                 # stays float32 (negligible bandwidth)

    target_elems = max(lane * sublane, target_tile_bytes // itemsize)
    min_rows = R if R < sublane else sublane      # rows any tile must carry at minimum

    # --- lane-padding guard: huge rows that are not 128-divisible (rare) ---
    C_pad = C
    if C % lane != 0 and C * min_rows > target_elems:
        C_pad = ((C + lane - 1) // lane) * lane
        x2 = jnp.pad(x2, ((0, 0), (0, C_pad - C)))
        pe2 = jnp.pad(pe2, ((0, 0), (0, C_pad - C)))

    # --- tile selection: tr * tc * itemsize <= target_tile_bytes by construction ---
    tc = _choose_col_tile(C_pad, min_rows, target_elems, lane)
    rows_budget = max(min_rows, target_elems // tc)
    if R <= min_rows:
        tr = R                                    # full dim -> exempt from the /8 granule
    else:
        tr = min(R, max(sublane, (rows_budget // sublane) * sublane))

    # --- ensure >= 2 blocks on a "parallel" axis for v7x's two TensorCores ---
    if (C_pad // tc) * pl.cdiv(R, tr) < 2 and R * C_pad * itemsize >= (1 << 20):
        if R >= 2 * sublane:
            # Halve the row tile, keeping the sublane granule.
            tr = ((R + 1) // 2 + sublane - 1) // sublane * sublane
        elif C_pad % lane == 0 and C_pad // lane >= 2:
            # Split the column axis instead.
            for k in range((C_pad // lane) // 2, 0, -1):
                if C_pad % (lane * k) == 0:
                    tc = lane * k
                    break

    n_col = C_pad // tc
    n_row = pl.cdiv(R, tr)

    # --- explicit VMEM budget: x + out double-buffered, plus the pe row, 25% headroom ---
    tile_bytes = tr * tc * itemsize
    pe_tile_bytes = tc * pe2.dtype.itemsize
    vmem_limit = int(1.25 * (4 * tile_bytes + 2 * pe_tile_bytes)) + (4 << 20)
    vmem_limit = min(vmem_limit, 48 << 20)        # headroom under v7x's 64 MiB physical VMEM

    out2 = pl.pallas_call(
        _pe_add_kernel,
        out_shape=jax.ShapeDtypeStruct((R, C_pad), x.dtype),
        grid_spec=pltpu.PrefetchScalarGridSpec(
            num_scalar_prefetch=0,
            grid=(n_col, n_row),                  # column outer -> pe block constant on inner loop
            in_specs=[
                pl.BlockSpec((tr, tc), lambda j, i: (i, j)),
                pl.BlockSpec((1, tc), lambda j, i: (0, j)),
            ],
            out_specs=pl.BlockSpec((tr, tc), lambda j, i: (i, j)),
        ),
        compiler_params=pltpu.CompilerParams(
            dimension_semantics=("parallel", "parallel"),
            vmem_limit_bytes=vmem_limit,
        ),
    )(x2, pe2)

    if C_pad != C:
        out2 = out2[:, :C]
    return out2.reshape(B, M, S, D)


if __name__ == "__main__":
    # Small shapes consistent with the module: (batch, n_modalities, seq_len, d_model)
    B, M, S, D = 2, 4, 8, 32
    max_len = 4096

    key = jax.random.PRNGKey(0)
    x = jax.random.normal(key, (B, M, S, D), dtype=jnp.float32)

    pe = _make_pe_table(D, max_len)

    out = positional_encoding_forward(x, pe)
    out = jax.block_until_ready(out)

    # Reference check (pure JAX) mirroring the PyTorch forward.
    ref = x + jnp.broadcast_to(pe[:S, :][None, None, :, :], (B, M, S, D))
    assert out.shape == (B, M, S, D)
    assert jnp.allclose(out, ref, atol=1e-6), "mismatch vs reference"

    print("KERNEL_OK")
</pallas_src>

<mosaic_0001>
module attributes {stable_mosaic.version = 11 : i64} {
  func.func @_pe_add_kernel(%arg0: i32, %arg1: i32, %arg2: memref<8x256xf32, #tpu.memory_space<vmem>>, %arg3: memref<1x256xf32, #tpu.memory_space<vmem>>, %arg4: memref<8x256xf32, #tpu.memory_space<vmem>>) attributes {dimension_semantics = [#tpu.dimension_semantics<parallel>, #tpu.dimension_semantics<parallel>], iteration_bounds = array<i64: 1, 1>, scalar_prefetch = 0 : i64, scratch_operands = 0 : i64, tpu.core_type = #tpu.core_type<tc>, window_params = [{transform_indices = @transform_0, window_bounds = array<i64: 8, 256>}, {transform_indices = @transform_1, window_bounds = array<i64: 1, 256>}, {transform_indices = @transform_2, window_bounds = array<i64: 8, 256>}]} {
    %c0 = arith.constant 0 : index
    %c0_0 = arith.constant 0 : index
    %0 = vector.load %arg2[%c0, %c0_0] : memref<8x256xf32, #tpu.memory_space<vmem>>, vector<8x256xf32>
    %c0_1 = arith.constant 0 : index
    %c0_2 = arith.constant 0 : index
    %1 = vector.load %arg3[%c0_1, %c0_2] : memref<1x256xf32, #tpu.memory_space<vmem>>, vector<1x256xf32>
    %2 = vector.broadcast %1 : vector<1x256xf32> to vector<8x256xf32>
    %3 = arith.addf %0, %2 : vector<8x256xf32>
    %c0_3 = arith.constant 0 : index
    %c0_4 = arith.constant 0 : index
    %4 = vector.load %arg4[%c0_3, %c0_4] : memref<8x256xf32, #tpu.memory_space<vmem>>, vector<8x256xf32>
    tpu.vector_store %arg4[%c0_3, %c0_4], %3 {strides = array<i32>} : memref<8x256xf32, #tpu.memory_space<vmem>>, vector<8x256xf32>,
    return
  }
  func.func @transform_0(%arg0: i32, %arg1: i32) -> (i32, i32) {
    %c0_i32 = arith.constant 0 : i32
    return %arg1, %arg0 : i32, i32
  }
  func.func @transform_1(%arg0: i32, %arg1: i32) -> (i32, i32) {
    %c0_i32 = arith.constant 0 : i32
    %c0_i32_0 = arith.constant 0 : i32
    return %c0_i32, %arg0 : i32, i32
  }
  func.func @transform_2(%arg0: i32, %arg1: i32) -> (i32, i32) {
    %c0_i32 = arith.constant 0 : i32
    return %arg1, %arg0 : i32, i32
  }
}

</mosaic_0001>

<bundles_post_ra>
// kernel: tpu_custom_call.1
= control target key start
LH: loop header
LB: loop body
LE: loop exit
PB: predicated region body
PF: predicated region fallthrough
CT: control target
= control target key end

     0   :  { %7 = vsyncpa [#allocation3], 0  ;;  %s166_s0 = inlined_call_operand.hbm [shape: f32[8,256], index: 0, kind: input, shape index: {}]   ;;  %s167_s1 = inlined_call_operand.hbm [shape: f32[1,256], index: 1, kind: input, shape index: {}]   ;;  %s168_s2 = inlined_call_operand.hbm [shape: f32[8,256], index: 2, kind: output, shape index: {}]  }
   0x1   :  { %8 = vsyncpa [#allocation6], 0 }
   0x2   :  { %9 = vsyncpa [#allocation4], 0  ;;  %s139_s9 = smov [#allocation2]   ;;  %s140_s11 = smov [#allocation5]  }
   0x3   :  { %s16_s10 = sshll.u32 %s139_s9, 4  ;;  %s26_s12 = sshll.u32 %s140_s11, 4  ;;  %s17_s10 = int_to_ptr.vmem [resolvable:$true] %s16_s10  ;;  %s27_s12 = int_to_ptr.vmem [resolvable:$true] %s26_s12 }
   0x4   :  { %s81_s13 = scalar_lea.vmem %s17_s10, 256  ;;  %p86_p1 = scmp.lt.s32.totalorder %s17_s10, %s17_s10 }
   0x5   :  { %p82_p0 = scmp.ne.s32.totalorder %s17_s10, %s81_s13  ;;  %p87_p2 = scmp.lt.s32.totalorder %s81_s13, %s81_s13 }
   0x7   :  { %p88_p3 = por %p87_p2, %p86_p1 }
   0x9   :  { %p89_p4 = pnand %p88_p3, %p82_p0 }
   0xb   :  { %92 = shalt.err (!%p89_p4)
}
   0xc   :  { %19 = dma.hbm_to_vmem [thread:$0]  %s166_s0, 256, %s17_s10, [#allocation3]  }
   0xd   :  { %s101_s16 = scalar_lea.vmem %s27_s12, 32  ;;  %p106_p6 = scmp.lt.s32.totalorder %s27_s12, %s27_s12 }
   0xe   :  { %p102_p5 = scmp.ne.s32.totalorder %s27_s12, %s101_s16  ;;  %p107_p7 = scmp.lt.s32.totalorder %s101_s16, %s101_s16 }
  0x10   :  { %p108_p8 = por %p107_p7, %p106_p6 }
  0x12   :  { %p109_p9 = pnand %p108_p8, %p102_p5 }
  0x14   :  { %112 = shalt.err (!%p109_p9)
}
  0x15   :  { %29 = dma.hbm_to_vmem [thread:$0]  %s167_s1, 32, %s27_s12, [#allocation6]  }
  0x16   :  { %133 = dma.done.wait [#allocation3], 256  }
  0x17   :  { %134 = vsyncadd [#allocation3], 4294967040 }
  0x18   :  { %135 = dma.done.wait [#allocation6], 32  }
  0x19   :  { %136 = vsyncadd [#allocation6], 4294967264  ;;  %v40_v0 = vlaneseq  ;;  %v36_v4 = vld [vmem:[#allocation2] sm:$0xff]  ;;  %v38_v5 = vld [vmem:[#allocation5] sm:$0x3]  ;;  %s141_s0 = smov [#allocation7]  }
  0x1a   :  { %v37_v6 = vld [vmem:[#allocation2 + $0x8] sm:$0xff]  ;;  %s60_s19 = sshll.u32 %s141_s0, 4  ;;  %s61_s19 = int_to_ptr.vmem [resolvable:$true] %s60_s19 }
  0x1b   :  { %v41_v1 = vshrl.u32 %v40_v0, 7  ;;  %s113_s1 = scalar_lea.vmem %s61_s19, 256  ;;  %p118_p11 = scmp.lt.s32.totalorder %s61_s19, %s61_s19 }
  0x1c   :  { %p114_p10 = scmp.ne.s32.totalorder %s61_s19, %s113_s1  ;;  %p119_p12 = scmp.lt.s32.totalorder %s113_s1, %s113_s1 }
  0x1d   :  { %v42_v2 = vsub.s32 0, %v41_v1  ;;  %v46_v3 = vsub.s32 1, %v41_v1 }
  0x1e   :  { %p120_p13 = por %p119_p12, %p118_p11 }
  0x1f   :  { %v43_v7 = vrot.slane %v38_v5, %v42_v2  ;;  %v47_v8 = vrot.slane %v38_v5, %v46_v3 }
  0x20   :  { %p121_p0 = pnand %p120_p13, %p114_p10 }
  0x21   :  { %v50_v9 = vadd.f32 %v43_v7, %v36_v4  ;;  %v51_v10 = vadd.f32 %v47_v8, %v37_v6 }
  0x23   :  { %52 = vst [vmem:[#allocation7] sm:$0xff] %v50_v9  ;;  %53 = vst [vmem:[#allocation7 + $0x8] sm:$0xff] %v51_v10 }
  0x24   :  { %124 = shalt.err (!%p121_p0)
}
  0x25   :  { %63 = dma.vmem_to_hbm [thread:$0]  %s61_s19, 256, %s168_s2, [#allocation4]  }
  0x26   :  { %137 = dma.done.wait [#allocation4], 256  }
  0x27   :  { %138 = vsyncadd [#allocation4], 4294967040 }
  0x28   :  { %67 = vsyncpa [#allocation3], 1 }
  0x29   :  { %68 = vsyncpa [#allocation6], 1 }
  0x2a   :  { %69 = vsyncpa [#allocation4], 1 }

</bundles_post_ra>
